<compile_context>
chip_gen: v7x
topology: tpu7x:2x2x1
jax: 0.10.0
libtpu: 0.0.40
codegen_flags: <defaults>
</compile_context>

<pallas_src>
import jax
import jax.numpy as jnp
from jax.experimental import pallas as pl
from jax.experimental.pallas import tpu as pltpu

# ---------------- model config (small, consistent with the module) ----------
STATE_DIM = 16
ACTION_DIM = 4
HIDDEN_DIMS = [32, 32]          # state_encoder -> one feature layer
HALF = HIDDEN_DIMS[1] // 2
BATCH = 8

# ---------------- packed-slab layout (static row offsets) --------------------
LANES = 128
R_ENC = 0                                   # enc_w        rows [0, 16)
R_F0 = R_ENC + STATE_DIM                    # f0_w'        rows [16, 48)
R_AV1 = R_F0 + HIDDEN_DIMS[0]               # (a1|v1)'     rows [48, 80)
R_Q = R_AV1 + HIDDEN_DIMS[1]                # fused W_q    rows [80, 112)
W_ROWS = R_Q + HIDDEN_DIMS[1]               # 112 rows (divisible by 8)

# vec slab rows: 0 enc_b, 1 f0_b', 2 av1_b', 3 q_b ; rows 4..7 zero padding
V_ROWS = 8

DEFAULT_TILE_B = 256                        # batch tile (multiple of 8 sublanes)


# ---------------------------- Pallas kernel ---------------------------------
def dqn_kernel(state_ref, w_ref, v_ref, out_ref):
    """One batch tile per grid step; parameter slabs stay VMEM-resident."""
    H0, H1, A = HIDDEN_DIMS[0], HIDDEN_DIMS[1], ACTION_DIM

    def ln_normalize(x, eps=1e-5):
        # Two-pass LayerNorm (affine folded into the next layer's weights).
        n = x.shape[-1]
        mu = jnp.sum(x, axis=-1, keepdims=True) * (1.0 / n)
        xc = x - mu
        var = jnp.sum(xc * xc, axis=-1, keepdims=True) * (1.0 / n)
        return xc * jax.lax.rsqrt(var + eps)

    x = state_ref[...].astype(jnp.float32)

    # state_encoder: Linear -> ReLU -> LayerNorm(normalize) -> Dropout(identity)
    y = jnp.dot(x, w_ref[R_ENC:R_ENC + STATE_DIM, 0:H0],
                preferred_element_type=jnp.float32) + v_ref[0:1, 0:H0]
    x = ln_normalize(jnp.maximum(y, 0.0))

    # feature layer 0 (enc-LN affine pre-folded into weights/bias)
    y = jnp.dot(x, w_ref[R_F0:R_F0 + H0, 0:H1],
                preferred_element_type=jnp.float32) + v_ref[1:2, 0:H1]
    x = ln_normalize(jnp.maximum(y, 0.0))

    # fused advantage|value hidden layer (f0-LN affine pre-folded)
    h = jnp.maximum(
        jnp.dot(x, w_ref[R_AV1:R_AV1 + H1, 0:H1],
                preferred_element_type=jnp.float32) + v_ref[2:3, 0:H1],
        0.0)

    # fused dueling head: q = h @ W_q + b_q   (mean-subtraction folded in)
    q = jnp.dot(h, w_ref[R_Q:R_Q + H1, 0:A],
                preferred_element_type=jnp.float32) + v_ref[3:4, 0:A]
    out_ref[...] = q.astype(out_ref.dtype)


# ------------------------------ wrapper --------------------------------------
def high_level_network(state, w_slab, vec_slab, tile_b=DEFAULT_TILE_B):
    """state: [batch, STATE_DIM] f32; w_slab: [112,128] f32; vec_slab: [8,128] f32."""
    b = state.shape[0]
    # Don't over-pad tiny batches; keep the 8-row sublane alignment.
    tile_b = int(min(tile_b, max(8, ((b + 7) // 8) * 8)))
    padded_b = ((b + tile_b - 1) // tile_b) * tile_b
    if padded_b != b:
        state = jnp.pad(state, ((0, padded_b - b), (0, 0)))
    grid = (padded_b // tile_b,)

    out = pl.pallas_call(
        dqn_kernel,
        out_shape=jax.ShapeDtypeStruct((padded_b, ACTION_DIM), jnp.float32),
        grid_spec=pltpu.PrefetchScalarGridSpec(
            num_scalar_prefetch=0,
            grid=grid,
            in_specs=[
                pl.BlockSpec((tile_b, STATE_DIM), lambda i: (i, 0)),
                pl.BlockSpec((W_ROWS, LANES), lambda i: (0, 0)),   # pinned slab
                pl.BlockSpec((V_ROWS, LANES), lambda i: (0, 0)),   # pinned slab
            ],
            out_specs=pl.BlockSpec((tile_b, ACTION_DIM), lambda i: (i, 0)),
        ),
        compiler_params=pltpu.CompilerParams(
            dimension_semantics=("parallel",)),   # v7x megacore sharding
    )(state, w_slab, vec_slab)
    return out[:b]


# --------------------- deterministic parameter init --------------------------
def init_params(key):
    ks = jax.random.split(key, 8)

    def lin(k, fan_in, fan_out):
        w = (jax.random.normal(k, (fan_in, fan_out), jnp.float32)
             * (1.0 / jnp.sqrt(fan_in)))
        b = jnp.zeros((fan_out,), jnp.float32)
        return w, b

    h0, h1 = HIDDEN_DIMS[0], HIDDEN_DIMS[1]

    enc_w, enc_b = lin(ks[0], STATE_DIM, h0)
    enc_g = jnp.ones((h0,), jnp.float32)
    enc_beta = jnp.zeros((h0,), jnp.float32)

    f0_w, f0_b = lin(ks[1], h0, h1)
    f0_g = jnp.ones((h1,), jnp.float32)
    f0_beta = jnp.zeros((h1,), jnp.float32)

    a1_w, a1_b = lin(ks[2], h1, HALF)
    a2_w, a2_b = lin(ks[3], HALF, ACTION_DIM)

    v1_w, v1_b = lin(ks[4], h1, HALF)
    v2_w, v2_b = lin(ks[5], HALF, 1)

    return dict(enc_w=enc_w, enc_b=enc_b, enc_g=enc_g, enc_beta=enc_beta,
                f0_w=f0_w, f0_b=f0_b, f0_g=f0_g, f0_beta=f0_beta,
                a1_w=a1_w, a1_b=a1_b, a2_w=a2_w, a2_b=a2_b,
                v1_w=v1_w, v1_b=v1_b, v2_w=v2_w, v2_b=v2_b)


# ---------------- host-side packing: 16 tensors -> 2 lane-dense slabs --------
def pack_params(p):
    """Fold LN affines and the dueling combine into the packed weights."""
    h0, h1, A = HIDDEN_DIMS[0], HIDDEN_DIMS[1], ACTION_DIM

    # encoder-LN affine folded into feature-layer-0 weights/bias
    f0_w_f = p["enc_g"][:, None] * p["f0_w"]
    f0_b_f = p["enc_beta"] @ p["f0_w"] + p["f0_b"]

    # fused a1|v1 hidden layer, f0-LN affine folded in
    av1_w = jnp.concatenate([p["a1_w"], p["v1_w"]], axis=1)     # [32, 32]
    av1_b = jnp.concatenate([p["a1_b"], p["v1_b"]], axis=0)     # [32]
    av1_w_f = p["f0_g"][:, None] * av1_w
    av1_b_f = p["f0_beta"] @ av1_w + av1_b

    # dueling combine folded into a single [32, A] output head:
    #   q = h_a @ (a2_w - rowmean(a2_w)) + h_v @ v2_w + (a2_b - mean(a2_b) + v2_b)
    a2_centered = p["a2_w"] - jnp.mean(p["a2_w"], axis=1, keepdims=True)  # [16, A]
    w_q = jnp.concatenate(
        [a2_centered, jnp.broadcast_to(p["v2_w"], (HALF, A))], axis=0)    # [32, A]
    b_q = p["a2_b"] - jnp.mean(p["a2_b"]) + p["v2_b"]                     # [A]

    w = jnp.zeros((W_ROWS, LANES), jnp.float32)
    w = w.at[R_ENC:R_ENC + STATE_DIM, 0:h0].set(p["enc_w"])
    w = w.at[R_F0:R_F0 + h0, 0:h1].set(f0_w_f)
    w = w.at[R_AV1:R_AV1 + h1, 0:h1].set(av1_w_f)
    w = w.at[R_Q:R_Q + h1, 0:A].set(w_q)

    v = jnp.zeros((V_ROWS, LANES), jnp.float32)
    v = v.at[0, 0:h0].set(p["enc_b"])
    v = v.at[1, 0:h1].set(f0_b_f)
    v = v.at[2, 0:h1].set(av1_b_f)
    v = v.at[3, 0:A].set(b_q)
    return w, v


# ------------------------- pure-JAX reference ---------------------------------
def reference_forward(state, p):
    def ln(x, g, b, eps=1e-5):
        mu = x.mean(-1, keepdims=True)
        var = ((x - mu) ** 2).mean(-1, keepdims=True)
        return (x - mu) / jnp.sqrt(var + eps) * g + b

    x = ln(jnp.maximum(state @ p["enc_w"] + p["enc_b"], 0.0),
           p["enc_g"], p["enc_beta"])
    x = ln(jnp.maximum(x @ p["f0_w"] + p["f0_b"], 0.0),
           p["f0_g"], p["f0_beta"])
    adv = jnp.maximum(x @ p["a1_w"] + p["a1_b"], 0.0) @ p["a2_w"] + p["a2_b"]
    val = jnp.maximum(x @ p["v1_w"] + p["v1_b"], 0.0) @ p["v2_w"] + p["v2_b"]
    return val + (adv - adv.mean(1, keepdims=True))


# --------------------------------- main ---------------------------------------
if __name__ == "__main__":
    key = jax.random.PRNGKey(0)
    k_state, k_params = jax.random.split(key)

    state = jax.random.normal(k_state, (BATCH, STATE_DIM), jnp.float32)
    params = init_params(k_params)
    w_slab, vec_slab = pack_params(params)

    # TODO(synk): Dropout(p=0.1) is identity in eval mode; training-mode RNG
    # dropout is intentionally not implemented in the kernel.
    q = high_level_network(state, w_slab, vec_slab)
    q = jax.block_until_ready(q)

    q_ref = reference_forward(state, params)
    assert q.shape == (BATCH, ACTION_DIM)
    assert jnp.allclose(q, q_ref, atol=1e-4, rtol=1e-4), "mismatch vs JAX reference"

    print("KERNEL_OK")
</pallas_src>

<mosaic_0001>
module attributes {stable_mosaic.version = 11 : i64} {
  func.func @dqn_kernel(%arg0: i32, %arg1: memref<8x16xf32, #tpu.memory_space<vmem>>, %arg2: memref<112x128xf32, #tpu.memory_space<vmem>>, %arg3: memref<8x128xf32, #tpu.memory_space<vmem>>, %arg4: memref<8x4xf32, #tpu.memory_space<vmem>>) attributes {dimension_semantics = [#tpu.dimension_semantics<parallel>], iteration_bounds = array<i64: 1>, scalar_prefetch = 0 : i64, scratch_operands = 0 : i64, tpu.core_type = #tpu.core_type<tc>, window_params = [{transform_indices = @transform_0, window_bounds = array<i64: 8, 16>}, {pipeline_mode = #tpu.pipeline_mode<synchronous>, transform_indices = @transform_1, window_bounds = array<i64: 112, 128>}, {pipeline_mode = #tpu.pipeline_mode<synchronous>, transform_indices = @transform_2, window_bounds = array<i64: 8, 128>}, {transform_indices = @transform_3, window_bounds = array<i64: 8, 4>}]} {
    %c0 = arith.constant 0 : index
    %c0_0 = arith.constant 0 : index
    %0 = vector.load %arg1[%c0, %c0_0] : memref<8x16xf32, #tpu.memory_space<vmem>>, vector<8x16xf32>
    %c0_1 = arith.constant 0 : index
    %c0_2 = arith.constant 0 : index
    %1 = vector.load %arg2[%c0_1, %c0_2] : memref<112x128xf32, #tpu.memory_space<vmem>>, vector<16x32xf32>
    %cst = arith.constant dense<0.000000e+00> : vector<8x32xf32>
    %2 = tpu.matmul %0, %1, %cst {dimension_numbers = #tpu.dot_dimension_numbers<[1], [0], [0], [1], [0, 0, 1, 1], [], []>} : vector<8x16xf32>, vector<16x32xf32>, vector<8x32xf32> -> vector<8x32xf32>
    %c0_3 = arith.constant 0 : index
    %c0_4 = arith.constant 0 : index
    %3 = vector.load %arg3[%c0_3, %c0_4] : memref<8x128xf32, #tpu.memory_space<vmem>>, vector<1x32xf32>
    %4 = vector.broadcast %3 : vector<1x32xf32> to vector<8x32xf32>
    %5 = arith.addf %2, %4 : vector<8x32xf32>
    %cst_5 = arith.constant 0.000000e+00 : f32
    %6 = vector.broadcast %cst_5 : f32 to vector<8x32xf32>
    %7 = arith.maximumf %5, %6 : vector<8x32xf32>
    %cst_6 = arith.constant dense<0.000000e+00> : vector<8xf32>
    %8 = vector.multi_reduction <add>, %7, %cst_6 [1] : vector<8x32xf32> to vector<8xf32>
    %9 = vector.shape_cast %8 : vector<8xf32> to vector<8x1xf32>
    %cst_7 = arith.constant 3.125000e-02 : f32
    %10 = vector.broadcast %cst_7 : f32 to vector<8x1xf32>
    %11 = arith.mulf %9, %10 : vector<8x1xf32>
    %12 = vector.broadcast %11 : vector<8x1xf32> to vector<8x32xf32>
    %13 = arith.subf %7, %12 : vector<8x32xf32>
    %14 = arith.mulf %13, %13 : vector<8x32xf32>
    %cst_8 = arith.constant dense<0.000000e+00> : vector<8xf32>
    %15 = vector.multi_reduction <add>, %14, %cst_8 [1] : vector<8x32xf32> to vector<8xf32>
    %16 = vector.shape_cast %15 : vector<8xf32> to vector<8x1xf32>
    %cst_9 = arith.constant 3.125000e-02 : f32
    %17 = vector.broadcast %cst_9 : f32 to vector<8x1xf32>
    %18 = arith.mulf %16, %17 : vector<8x1xf32>
    %cst_10 = arith.constant 9.99999974E-6 : f32
    %19 = vector.broadcast %cst_10 : f32 to vector<8x1xf32>
    %20 = arith.addf %18, %19 : vector<8x1xf32>
    %21 = math.rsqrt %20 : vector<8x1xf32>
    %22 = vector.broadcast %21 : vector<8x1xf32> to vector<8x32xf32>
    %23 = arith.mulf %13, %22 : vector<8x32xf32>
    %c16 = arith.constant 16 : index
    %c0_11 = arith.constant 0 : index
    %24 = vector.load %arg2[%c16, %c0_11] : memref<112x128xf32, #tpu.memory_space<vmem>>, vector<32x32xf32>
    %cst_12 = arith.constant dense<0.000000e+00> : vector<8x32xf32>
    %25 = tpu.matmul %23, %24, %cst_12 {dimension_numbers = #tpu.dot_dimension_numbers<[1], [0], [0], [1], [0, 0, 1, 1], [], []>} : vector<8x32xf32>, vector<32x32xf32>, vector<8x32xf32> -> vector<8x32xf32>
    %c1 = arith.constant 1 : index
    %c0_13 = arith.constant 0 : index
    %26 = vector.load %arg3[%c1, %c0_13] : memref<8x128xf32, #tpu.memory_space<vmem>>, vector<1x32xf32>
    %27 = vector.broadcast %26 : vector<1x32xf32> to vector<8x32xf32>
    %28 = arith.addf %25, %27 : vector<8x32xf32>
    %cst_14 = arith.constant 0.000000e+00 : f32
    %29 = vector.broadcast %cst_14 : f32 to vector<8x32xf32>
    %30 = arith.maximumf %28, %29 : vector<8x32xf32>
    %cst_15 = arith.constant dense<0.000000e+00> : vector<8xf32>
    %31 = vector.multi_reduction <add>, %30, %cst_15 [1] : vector<8x32xf32> to vector<8xf32>
    %32 = vector.shape_cast %31 : vector<8xf32> to vector<8x1xf32>
    %cst_16 = arith.constant 3.125000e-02 : f32
    %33 = vector.broadcast %cst_16 : f32 to vector<8x1xf32>
    %34 = arith.mulf %32, %33 : vector<8x1xf32>
    %35 = vector.broadcast %34 : vector<8x1xf32> to vector<8x32xf32>
    %36 = arith.subf %30, %35 : vector<8x32xf32>
    %37 = arith.mulf %36, %36 : vector<8x32xf32>
    %cst_17 = arith.constant dense<0.000000e+00> : vector<8xf32>
    %38 = vector.multi_reduction <add>, %37, %cst_17 [1] : vector<8x32xf32> to vector<8xf32>
    %39 = vector.shape_cast %38 : vector<8xf32> to vector<8x1xf32>
    %cst_18 = arith.constant 3.125000e-02 : f32
    %40 = vector.broadcast %cst_18 : f32 to vector<8x1xf32>
    %41 = arith.mulf %39, %40 : vector<8x1xf32>
    %cst_19 = arith.constant 9.99999974E-6 : f32
    %42 = vector.broadcast %cst_19 : f32 to vector<8x1xf32>
    %43 = arith.addf %41, %42 : vector<8x1xf32>
    %44 = math.rsqrt %43 : vector<8x1xf32>
    %45 = vector.broadcast %44 : vector<8x1xf32> to vector<8x32xf32>
    %46 = arith.mulf %36, %45 : vector<8x32xf32>
    %c48 = arith.constant 48 : index
    %c0_20 = arith.constant 0 : index
    %47 = vector.load %arg2[%c48, %c0_20] : memref<112x128xf32, #tpu.memory_space<vmem>>, vector<32x32xf32>
    %cst_21 = arith.constant dense<0.000000e+00> : vector<8x32xf32>
    %48 = tpu.matmul %46, %47, %cst_21 {dimension_numbers = #tpu.dot_dimension_numbers<[1], [0], [0], [1], [0, 0, 1, 1], [], []>} : vector<8x32xf32>, vector<32x32xf32>, vector<8x32xf32> -> vector<8x32xf32>
    %c2 = arith.constant 2 : index
    %c0_22 = arith.constant 0 : index
    %49 = vector.load %arg3[%c2, %c0_22] : memref<8x128xf32, #tpu.memory_space<vmem>>, vector<1x32xf32>
    %50 = vector.broadcast %49 : vector<1x32xf32> to vector<8x32xf32>
    %51 = arith.addf %48, %50 : vector<8x32xf32>
    %cst_23 = arith.constant 0.000000e+00 : f32
    %52 = vector.broadcast %cst_23 : f32 to vector<8x32xf32>
    %53 = arith.maximumf %51, %52 : vector<8x32xf32>
    %c80 = arith.constant 80 : index
    %c0_24 = arith.constant 0 : index
    %54 = vector.load %arg2[%c80, %c0_24] : memref<112x128xf32, #tpu.memory_space<vmem>>, vector<32x4xf32>
    %cst_25 = arith.constant dense<0.000000e+00> : vector<8x4xf32>
    %55 = tpu.matmul %53, %54, %cst_25 {dimension_numbers = #tpu.dot_dimension_numbers<[1], [0], [0], [1], [0, 0, 1, 1], [], []>} : vector<8x32xf32>, vector<32x4xf32>, vector<8x4xf32> -> vector<8x4xf32>
    %c3 = arith.constant 3 : index
    %c0_26 = arith.constant 0 : index
    %56 = vector.load %arg3[%c3, %c0_26] : memref<8x128xf32, #tpu.memory_space<vmem>>, vector<1x4xf32>
    %57 = vector.broadcast %56 : vector<1x4xf32> to vector<8x4xf32>
    %58 = arith.addf %55, %57 : vector<8x4xf32>
    %c0_27 = arith.constant 0 : index
    %c0_28 = arith.constant 0 : index
    %59 = vector.load %arg4[%c0_27, %c0_28] : memref<8x4xf32, #tpu.memory_space<vmem>>, vector<8x4xf32>
    tpu.vector_store %arg4[%c0_27, %c0_28], %58 {strides = array<i32>} : memref<8x4xf32, #tpu.memory_space<vmem>>, vector<8x4xf32>,
    return
  }
  func.func @transform_0(%arg0: i32) -> (i32, i32) {
    %c0_i32 = arith.constant 0 : i32
    %c0_i32_0 = arith.constant 0 : i32
    return %arg0, %c0_i32 : i32, i32
  }
  func.func @transform_1(%arg0: i32) -> (i32, i32) {
    %c0_i32 = arith.constant 0 : i32
    %c0_i32_0 = arith.constant 0 : i32
    %c0_i32_1 = arith.constant 0 : i32
    return %c0_i32, %c0_i32_0 : i32, i32
  }
  func.func @transform_2(%arg0: i32) -> (i32, i32) {
    %c0_i32 = arith.constant 0 : i32
    %c0_i32_0 = arith.constant 0 : i32
    %c0_i32_1 = arith.constant 0 : i32
    return %c0_i32, %c0_i32_0 : i32, i32
  }
  func.func @transform_3(%arg0: i32) -> (i32, i32) {
    %c0_i32 = arith.constant 0 : i32
    %c0_i32_0 = arith.constant 0 : i32
    return %arg0, %c0_i32 : i32, i32
  }
}

</mosaic_0001>

<bundles_post_ra>
// kernel: tpu_custom_call.1
= control target key start
LH: loop header
LB: loop body
LE: loop exit
PB: predicated region body
PF: predicated region fallthrough
CT: control target
= control target key end

     0   :  { %8 = vsyncpa [#allocation3], 0  ;;  %s671_s0 = inlined_call_operand.hbm [shape: f32[8,16], index: 0, kind: input, shape index: {}]   ;;  %s672_s1 = inlined_call_operand.hbm [shape: f32[112,128], index: 1, kind: input, shape index: {}]   ;;  %s673_s2 = inlined_call_operand.hbm [shape: f32[8,128], index: 2, kind: input, shape index: {}]   ;;  %s674_s3 = inlined_call_operand.vmem [shape: f32[8,4], index: 3, kind: output, shape index: {}]  }
   0x1   :  { %9 = vsyncpa [#allocation5], 0  ;;  %s586_s12 = smov [#allocation4]   ;;  %s516_s16 = scalar_lea.hbm %s672_s1, 1792 }
   0x2   :  { %s25_s13 = sshll.u32 %s586_s12, 4  ;;  %p517_p0 = scmp.ne.s32.totalorder %s672_s1, %s516_s16  ;;  %s26_s13 = int_to_ptr.vmem [resolvable:$true] %s25_s13 }
   0x3   :  { %p520_p1 = scmp.lt.u32.totalorder %s516_s16, %s672_s1 }
   0x5   :  { %p522_p2 = pnand %p520_p1, %p517_p0 }
   0x7   :  { %525 = shalt.err (!%p522_p2)
}
   0x8   :  { %s526_s21 = scalar_lea.vmem %s26_s13, 1792  ;;  %p531_p4 = scmp.lt.s32.totalorder %s26_s13, %s26_s13 }
   0x9   :  { %p527_p3 = scmp.ne.s32.totalorder %s26_s13, %s526_s21  ;;  %p532_p5 = scmp.lt.s32.totalorder %s526_s21, %s526_s21 }
   0xb   :  { %p533_p6 = por %p532_p5, %p531_p4 }
   0xd   :  { %p534_p7 = pnand %p533_p6, %p527_p3 }
   0xf   :  { %537 = shalt.err (!%p534_p7)
}
  0x10   :  { %s587_s22 = smov 128   ;;  %s588_s23 = smov 8  }
  0x11   :  { %31 = dma.hbm_to_vmem [thread:$0]  %s672_s1, 1792, %s26_s13, [#allocation5], %s587_s22, %s587_s22, %s588_s23  }
  0x12   :  { %s589_s26 = smov [#allocation2]   ;;  %s590_s28 = smov [#allocation6]  }
  0x13   :  { %s16_s27 = sshll.u32 %s589_s26, 4  ;;  %s38_s29 = sshll.u32 %s590_s28, 4  ;;  %s17_s27 = int_to_ptr.vmem [resolvable:$true] %s16_s27  ;;  %s39_s29 = int_to_ptr.vmem [resolvable:$true] %s38_s29 }
  0x14   :  { %s538_s5 = scalar_lea.hbm %s671_s0, 128 }
  0x15   :  { %p539_p8 = scmp.ne.s32.totalorder %s671_s0, %s538_s5  ;;  %p542_p9 = scmp.lt.u32.totalorder %s538_s5, %s671_s0 }
  0x17   :  { %p544_p10 = pnand %p542_p9, %p539_p8 }
  0x19   :  { %547 = shalt.err (!%p544_p10)
}
  0x1a   :  { %s548_s1 = scalar_lea.vmem %s17_s27, 128  ;;  %p553_p12 = scmp.lt.s32.totalorder %s17_s27, %s17_s27 }
  0x1b   :  { %p549_p11 = scmp.ne.s32.totalorder %s17_s27, %s548_s1  ;;  %p554_p13 = scmp.lt.s32.totalorder %s548_s1, %s548_s1 }
  0x1d   :  { %p555_p0 = por %p554_p13, %p553_p12 }
  0x1f   :  { %p556_p1 = pnand %p555_p0, %p549_p11 }
  0x21   :  { %559 = shalt.err (!%p556_p1)
}
  0x22   :  { %19 = dma.hbm_to_vmem [thread:$0]  %s671_s0, 128, %s17_s27, [#allocation3]  }
  0x23   :  { %s560_s14 = scalar_lea.hbm %s673_s2, 128 }
  0x24   :  { %p561_p2 = scmp.ne.s32.totalorder %s673_s2, %s560_s14  ;;  %p564_p3 = scmp.lt.u32.totalorder %s560_s14, %s673_s2 }
  0x26   :  { %p566_p4 = pnand %p564_p3, %p561_p2 }
  0x28   :  { %569 = shalt.err (!%p566_p4)
}
  0x29   :  { %s570_s19 = scalar_lea.vmem %s39_s29, 128  ;;  %p575_p6 = scmp.lt.s32.totalorder %s39_s29, %s39_s29 }
  0x2a   :  { %p571_p5 = scmp.ne.s32.totalorder %s39_s29, %s570_s19  ;;  %p576_p7 = scmp.lt.s32.totalorder %s570_s19, %s570_s19 }
  0x2c   :  { %p577_p8 = por %p576_p7, %p575_p6 }
  0x2e   :  { %p578_p9 = pnand %p577_p8, %p571_p5 }
  0x30   :  { %581 = shalt.err (!%p578_p9)
}
  0x31   :  { %41 = dma.hbm_to_vmem [thread:$0]  %s673_s2, 128, %s39_s29, [#allocation5]  }
  0x32   :  { %582 = dma.done.wait [#allocation3], 128  }
  0x33   :  { %583 = vsyncadd [#allocation3], 4294967168 }
  0x34   :  { %584 = dma.done.wait [#allocation5], 1920  }
  0x35   :  { %585 = vsyncadd [#allocation5], 4294965376  ;;  %v591_v0 = vmov 0.0|0.0   ;;  %vm592_vm0 = vmmov 0   ;;  %v593_v1 = vmov 0.0   ;;  %v52_v2 = vld [vmem:[#allocation4] sm:$0xff] }
  0x36   :  { %483 = vmatprep.subr.bf16.mxu0 %v591_v0  ;;  %447 = vmatprep.mubr.msk.f32.mxu0 %vm592_vm0, %v593_v1  ;;  %v53_v3 = vld [vmem:[#allocation4 + $0x8] sm:$0xff]  ;;  %v51_v5 = vld [vmem:[#allocation2] sm:$0xff]  ;;  %vm59_vm1 = vcmask 130048   ;;  %v417_v6 = vld [vmem:[#allocation6] ss:$0 sm:$0xff]  ;;  %vm134_vm2 = vcmask 261120  }
  0x37   :  { %486 = vmatprep.subr.bf16.mxu1 %v591_v0  ;;  %458 = vmatprep.mubr.msk.f32.mxu1 %vm592_vm0, %v593_v1  ;;  %v484_v4 = vpack.c.bf16 %v53_v3, %v52_v2  ;;  %v148_v17 = vld [vmem:[#allocation4 + $0x10] sm:$0xff]  ;;  %v149_v18 = vld [vmem:[#allocation4 + $0x18] sm:$0xff]  ;;  %v150_v19 = vld [vmem:[#allocation4 + $0x20] sm:$0xff]  ;;  %vm409_vm3 = vcmask 31744  }
  0x38   :  { %v487_v20 = vpack.c.bf16 %v149_v18, %v148_v17  ;;  %v151_v21 = vld [vmem:[#allocation4 + $0x28] sm:$0xff]  ;;  %v419_v28 = vld [vmem:[#allocation6 + $0x1] ss:$0 sm:$0xff]  ;;  %v245_v40 = vld [vmem:[#allocation4 + $0x38] sm:$0xff] }
  0x39   :  { %485 = vmatpush3.bf16.msra.mxu0 %v484_v4  ;;  %v490_v22 = vpack.c.bf16 %v151_v21, %v150_v19  ;;  %v244_v39 = vld [vmem:[#allocation4 + $0x30] sm:$0xff]  ;;  %v246_v42 = vld [vmem:[#allocation4 + $0x40] sm:$0xff]  ;;  %v247_v43 = vld [vmem:[#allocation4 + $0x48] sm:$0xff] }
  0x3a   :  { %492 = vmatprep.subr.bf16.mxu0 %v591_v0  ;;  %488 = vmatpush3.bf16.msra.mxu1 %v487_v20  ;;  %v493_v41 = vpack.c.bf16 %v245_v40, %v244_v39  ;;  %v496_v44 = vpack.c.bf16 %v247_v43, %v246_v42  ;;  %v327_v45 = vld [vmem:[#allocation4 + $0x50] sm:$0xff]  ;;  %v328_v46 = vld [vmem:[#allocation4 + $0x58] sm:$0xff]  ;;  %v329_v53 = vld [vmem:[#allocation4 + $0x60] sm:$0xff] }
  0x3b   :  { %489 = vmatprep.subr.bf16.mxu1 %v591_v0  ;;  %v499_v47 = vpack.c.bf16 %v328_v46, %v327_v45  ;;  %v330_v54 = vld [vmem:[#allocation4 + $0x68] sm:$0xff]  ;;  %v421_v56 = vld [vmem:[#allocation6 + $0x2] ss:$0 sm:$0xff]  ;;  %v423_v61 = vld [vmem:[#allocation6 + $0x3] ss:$0 sm:$0xff] }
  0x3c   :  { %448 = vmatmul.mubr.msk.f32.vlgmr.msra.gmra.mrb[0].mxu0 %vm59_vm1, %v51_v5  ;;  %v502_v55 = vpack.c.bf16 %v330_v54, %v329_v53 }
  0x3d   :  { %469 = vmatprep.mubr.msk.f32.mxu0 %vm592_vm0, %v593_v1  ;;  %494 = vmatpush3.bf16.msra.mxu0 %v493_v41 }
  0x3e   :  { %491 = vmatpush3.bf16.msra.mxu1 %v490_v22  ;;  %495 = vmatprep.subr.bf16.mxu0 %v591_v0 }
  0x3f   :  { %498 = vmatprep.subr.bf16.mxu1 %v591_v0 }
  0x41   :  { %497 = vmatpush3.bf16.msra.mxu0 %v496_v44 }
 0x10f   :  { %v129_v7 = vpop.f32.mrb[0].mxu0 }
 0x110   :  { %v130_v8 = vadd.f32 %v417_v6, %v129_v7  ;;  %v449_v9 = vpop.f32.mrb[1].mxu0 }
 0x112   :  { %v133_v10 = vmax.f32 %v130_v8, 0.0 }
 0x114   :  { %v135_v11 = vsel %vm134_vm2, %v133_v10, 0.0 }
 0x115   :  { %136 = vadd.xlane.f32.xlu0 %v135_v11 }
 0x1a2   :  { %v137_v12 = vpop.xlane.xlu0 %136 }
 0x1a3   :  { %v138_v13 = vmul.f32 0.03125, %v137_v12 }
 0x1a5   :  { %v139_v14 = vsub.f32 %v133_v10, %v138_v13 }
 0x1a7   :  { %v140_v15 = vmul.f32 %v139_v14, %v139_v14 }
 0x1a9   :  { %v141_v16 = vsel %vm134_vm2, %v140_v15, 0.0 }
 0x1aa   :  { %142 = vadd.xlane.f32.xlu0 %v141_v16 }
 0x237   :  { %v143_v23 = vpop.xlane.xlu0 %142 }
 0x238   :  { %v144_v24 = vmul.f32 0.03125, %v143_v23 }
 0x23a   :  { %v145_v25 = vadd.f32 1e-05, %v144_v24 }
 0x23c   :  { %512 = vrsqrt.f32 %v145_v25 }
 0x246   :  { %v513_v26 = vpop.eup %512 }
 0x247   :  { %v147_v27 = vmul.f32 %v513_v26, %v139_v14 }
 0x249   :  { %459 = vmatmul.mubr.msk.f32.vlgmr.msra.gmra.mrb[0].mxu1 %vm134_vm2, %v147_v27 }
 0x24a   :  { %480 = vmatprep.mubr.msk.f32.mxu1 %vm592_vm0, %v593_v1  ;;  %500 = vmatpush3.bf16.msra.mxu1 %v499_v47 }
 0x24b   :  { %501 = vmatprep.subr.bf16.mxu1 %v591_v0 }
 0x24e   :  { %503 = vmatpush3.bf16.msra.mxu1 %v502_v55 }
 0x31c   :  { %v226_v29 = vpop.f32.mrb[0].mxu1 }
 0x31d   :  { %v227_v30 = vadd.f32 %v419_v28, %v226_v29  ;;  %v460_v31 = vpop.f32.mrb[1].mxu1 }
 0x31f   :  { %v230_v32 = vmax.f32 %v227_v30, 0.0 }
 0x321   :  { %v231_v33 = vsel %vm134_vm2, %v230_v32, 0.0 }
 0x322   :  { %232 = vadd.xlane.f32.xlu1 %v231_v33 }
 0x3af   :  { %v233_v34 = vpop.xlane.xlu1 %232 }
 0x3b0   :  { %v234_v35 = vmul.f32 0.03125, %v233_v34 }
 0x3b2   :  { %v235_v36 = vsub.f32 %v230_v32, %v234_v35 }
 0x3b4   :  { %v236_v37 = vmul.f32 %v235_v36, %v235_v36 }
 0x3b6   :  { %v237_v38 = vsel %vm134_vm2, %v236_v37, 0.0 }
 0x3b7   :  { %238 = vadd.xlane.f32.xlu1 %v237_v38 }
 0x444   :  { %v239_v48 = vpop.xlane.xlu1 %238 }
 0x445   :  { %v240_v49 = vmul.f32 0.03125, %v239_v48 }
 0x447   :  { %v241_v50 = vadd.f32 1e-05, %v240_v49 }
 0x449   :  { %514 = vrsqrt.f32 %v241_v50 }
 0x453   :  { %v515_v51 = vpop.eup %514 }
 0x454   :  { %v243_v52 = vmul.f32 %v515_v51, %v235_v36 }
 0x456   :  { %470 = vmatmul.mubr.msk.f32.vlgmr.msra.gmra.mrb[2].mxu0 %vm134_vm2, %v243_v52 }
 0x529   :  { %v322_v57 = vpop.f32.mrb[2].mxu0 }
 0x52a   :  { %v323_v58 = vadd.f32 %v421_v56, %v322_v57  ;;  %v471_v59 = vpop.f32.mrb[3].mxu0 }
 0x52c   :  { %v326_v60 = vmax.f32 %v323_v58, 0.0 }
 0x52e   :  { %481 = vmatmul.mubr.msk.f32.vlgmr.msra.gmra.mrb[2].mxu1 %vm134_vm2, %v326_v60 }
 0x601   :  { %v405_v62 = vpop.f32.mrb[2].mxu1 }
 0x602   :  { %v406_v63 = vadd.f32 %v423_v61, %v405_v62  ;;  %v482_v0 = vpop.f32.mrb[3].mxu1 }
 0x604   :  { %410 = vst.msk [vmem:[%s674_s3] sm:$0xff] %vm409_vm3, %v406_v63 }
 0x605   :  { %415 = vsyncpa [#allocation3], 1 }
 0x606   :  { %416 = vsyncpa [#allocation5], 1 }

</bundles_post_ra>
